<compile_context>
chip_gen: v7x
topology: tpu7x:2x2x1
jax: 0.10.0
libtpu: 0.0.40
codegen_flags: <defaults>
</compile_context>

<pallas_src>
import functools

import jax
import jax.numpy as jnp
from jax import lax
from jax.experimental import pallas as pl
from jax.experimental.pallas import tpu as pltpu

# BatteryTrainingConfig defaults used by the loss
PHYSICS_LOSS_WEIGHT = 0.1
CONSISTENCY_LOSS_WEIGHT = 0.05

# (4096, F) f32 block ~= 2 MiB in VMEM after lane padding; x2 inputs x2
# pipeline buffers ~= 8 MiB -> fits v5e's 16 MiB scoped default with headroom.
_MAX_TILE_ROWS = 4096


def _choose_tile(batch):
    """Pick a batch-tile size (multiple of 8 that divides `batch`), else 1 block."""
    if batch <= _MAX_TILE_ROWS or batch % 8 != 0:
        # Single resident block (covers the small-batch / odd-batch cases).
        return batch, 1
    tile = _MAX_TILE_ROWS
    while batch % tile != 0:
        tile -= 8
    return tile, batch // tile


def _battery_loss_kernel(pred_ref, targ_ref, out_ref, acc_ref, prev_ref, *,
                         B, F, tile_b, num_tiles, physics_w, consist_w):
    i = pl.program_id(0)

    pred = pred_ref[...].astype(jnp.float32)   # (tile_b, F) block in VMEM
    targ = targ_ref[...].astype(jnp.float32)

    row = lax.broadcasted_iota(jnp.int32, (tile_b, F), 0)
    col = lax.broadcasted_iota(jnp.int32, (tile_b, F), 1)
    soh_mask = col == 0          # feature 0 = SoH
    deg_mask = col >= 1          # features 1: = degradation metrics

    d = pred - targ

    # --- SoH: SmoothL1 (huber, beta=1.0) partial sum ---
    ad = jnp.abs(d)
    huber = jnp.where(ad < 1.0, 0.5 * d * d, ad - 0.5)
    huber_sum = jnp.sum(jnp.where(soh_mask, huber, 0.0))

    # --- degradation: MSE partial sum ---
    deg_sum = jnp.sum(jnp.where(deg_mask, d * d, 0.0))

    # --- physics constraints (no metadata => no temperature term) ---
    relu_neg = jnp.maximum(-pred, 0.0)                      # relu(-x)
    phys_soh_sum = jnp.sum(jnp.where(
        soh_mask, relu_neg + jnp.maximum(pred - 1.0, 0.0), 0.0))
    phys_deg_sum = jnp.sum(jnp.where(deg_mask, relu_neg, 0.0))

    # --- temporal consistency: sum_j relu(soh[j+1] - soh[j]) within the tile ---
    if B >= 2 and tile_b >= 2:
        nxt = pltpu.roll(pred, shift=tile_b - 1, axis=0)    # row j -> pred[j+1 mod tile_b]
        in_tile_mask = soh_mask & (row < tile_b - 1)
        cons_sum = jnp.sum(jnp.where(in_tile_mask,
                                     jnp.maximum(nxt - pred, 0.0), 0.0))
    else:
        cons_sum = jnp.float32(0.0)

    if num_tiles == 1:
        # Single resident block: write the normalized losses directly.
        soh_loss = huber_sum / B
        deg_loss = deg_sum / (B * (F - 1))
        physics = phys_soh_sum / B + phys_deg_sum / (B * (F - 1))
        consistency = (cons_sum / (B - 1)) if B >= 2 else jnp.float32(0.0)
        total = soh_loss + deg_loss + physics_w * physics + consist_w * consistency
        out_ref[0] = total
        out_ref[1] = soh_loss
        out_ref[2] = deg_loss
        out_ref[3] = physics
        out_ref[4] = consistency
    else:
        @pl.when(i == 0)
        def _init():
            for k in range(5):
                acc_ref[k] = 0.0
            prev_ref[...] = jnp.zeros_like(prev_ref)

        # Consistency pair that straddles the previous tile:
        #   relu(this_tile_soh[0] - prev_tile_soh[-1])
        bmask = soh_mask & (row == 0)
        boundary = jnp.sum(jnp.where(
            bmask, jnp.maximum(pred - prev_ref[...], 0.0), 0.0))
        cons_sum = cons_sum + jnp.where(i > 0, boundary, 0.0)

        acc_ref[0] += huber_sum
        acc_ref[1] += deg_sum
        acc_ref[2] += phys_soh_sum
        acc_ref[3] += phys_deg_sum
        acc_ref[4] += cons_sum

        # Carry this tile's last row for the next tile's boundary pair.
        prev_ref[...] = jnp.sum(jnp.where(row == tile_b - 1, pred, 0.0),
                                axis=0, keepdims=True)

        @pl.when(i == num_tiles - 1)
        def _finalize():
            soh_loss = acc_ref[0] / B
            deg_loss = acc_ref[1] / (B * (F - 1))
            physics = acc_ref[2] / B + acc_ref[3] / (B * (F - 1))
            consistency = acc_ref[4] / (B - 1)
            total = (soh_loss + deg_loss
                     + physics_w * physics + consist_w * consistency)
            out_ref[0] = total
            out_ref[1] = soh_loss
            out_ref[2] = deg_loss
            out_ref[3] = physics
            out_ref[4] = consistency


def battery_loss(predictions, targets, *,
                 physics_w=PHYSICS_LOSS_WEIGHT,
                 consist_w=CONSISTENCY_LOSS_WEIGHT):
    """Pallas implementation of BatteryLossFunction.forward (battery_metadata=None)."""
    B, F = predictions.shape
    assert targets.shape == (B, F)
    assert F >= 2, "need at least SoH + one degradation feature"

    tile_b, num_tiles = _choose_tile(B)

    kernel = functools.partial(
        _battery_loss_kernel, B=B, F=F, tile_b=tile_b, num_tiles=num_tiles,
        physics_w=physics_w, consist_w=consist_w)

    grid_spec = pltpu.PrefetchScalarGridSpec(
        num_scalar_prefetch=0,
        grid=(num_tiles,),
        in_specs=[pl.BlockSpec((tile_b, F), lambda i: (i, 0)),
                  pl.BlockSpec((tile_b, F), lambda i: (i, 0))],
        out_specs=pl.BlockSpec(memory_space=pltpu.MemorySpace.SMEM),
        scratch_shapes=[pltpu.SMEM((5,), jnp.float32),      # partial-sum accumulator
                        pltpu.VMEM((1, F), jnp.float32)],   # last-row carry for consistency
    )

    out = pl.pallas_call(
        kernel,
        out_shape=jax.ShapeDtypeStruct((5,), jnp.float32),
        grid_spec=grid_spec,
        compiler_params=pltpu.CompilerParams(
            dimension_semantics=("arbitrary",)),   # accumulator + carry across tiles
    )(predictions, targets)

    return {
        'total_loss': out[0],
        'soh_loss': out[1],
        'degradation_loss': out[2],
        'physics_loss': out[3],
        'consistency_loss': out[4],
    }


def _reference_loss(pred, targ, physics_w=PHYSICS_LOSS_WEIGHT,
                    consist_w=CONSISTENCY_LOSS_WEIGHT):
    """Plain-JAX reference mirroring the PyTorch module (no metadata)."""
    pred = pred.astype(jnp.float32)
    targ = targ.astype(jnp.float32)
    soh_p, soh_t = pred[:, 0], targ[:, 0]
    deg_p, deg_t = pred[:, 1:], targ[:, 1:]
    d = soh_p - soh_t
    ad = jnp.abs(d)
    soh_loss = jnp.mean(jnp.where(ad < 1.0, 0.5 * d * d, ad - 0.5))
    deg_loss = jnp.mean((deg_p - deg_t) ** 2)
    physics = (jnp.mean(jnp.maximum(-soh_p, 0.0))
               + jnp.mean(jnp.maximum(soh_p - 1.0, 0.0))
               + jnp.mean(jnp.maximum(-deg_p, 0.0)))
    consistency = (jnp.mean(jnp.maximum(soh_p[1:] - soh_p[:-1], 0.0))
                   if pred.shape[0] >= 2 else jnp.float32(0.0))
    total = soh_loss + deg_loss + physics_w * physics + consist_w * consistency
    return {'total_loss': total, 'soh_loss': soh_loss,
            'degradation_loss': deg_loss, 'physics_loss': physics,
            'consistency_loss': consistency}


if __name__ == "__main__":
    # Small shapes: batch=8 samples, 8 outputs (SoH + 7 degradation metrics).
    key = jax.random.PRNGKey(0)
    kp, kt = jax.random.split(key)
    B, F = 8, 8
    predictions = jax.random.normal(kp, (B, F), dtype=jnp.float32) * 0.5 + 0.7
    targets = jax.random.normal(kt, (B, F), dtype=jnp.float32) * 0.5 + 0.7

    losses = battery_loss(predictions, targets)
    jax.block_until_ready(losses['total_loss'])

    ref = _reference_loss(predictions, targets)
    for k in losses:
        assert jnp.allclose(losses[k], ref[k], rtol=1e-5, atol=1e-5), (
            k, losses[k], ref[k])

    print("KERNEL_OK")
</pallas_src>

<mosaic_0001>
module attributes {stable_mosaic.version = 11 : i64} {
  func.func @_battery_loss_kernel(%arg0: i32, %arg1: memref<8x8xf32, #tpu.memory_space<vmem>>, %arg2: memref<8x8xf32, #tpu.memory_space<vmem>>, %arg3: memref<5xf32, #tpu.memory_space<smem>>, %arg4: memref<5xf32, #tpu.memory_space<smem>>, %arg5: memref<1x8xf32, #tpu.memory_space<vmem>>) attributes {dimension_semantics = [#tpu.dimension_semantics<arbitrary>], iteration_bounds = array<i64: 1>, scalar_prefetch = 0 : i64, scratch_operands = 2 : i64, tpu.core_type = #tpu.core_type<tc>, window_params = [{transform_indices = @transform_0, window_bounds = array<i64: 8, 8>}, {transform_indices = @transform_1, window_bounds = array<i64: 8, 8>}, {transform_indices = @transform_2, window_bounds = array<i64: 5>}]} {
    %c0 = arith.constant 0 : index
    %c0_0 = arith.constant 0 : index
    %0 = vector.load %arg1[%c0, %c0_0] : memref<8x8xf32, #tpu.memory_space<vmem>>, vector<8x8xf32>
    %c0_1 = arith.constant 0 : index
    %c0_2 = arith.constant 0 : index
    %1 = vector.load %arg2[%c0_1, %c0_2] : memref<8x8xf32, #tpu.memory_space<vmem>>, vector<8x8xf32>
    %2 = tpu.iota {dimensions = array<i32: 0>} : vector<8x8xi32>
    %3 = tpu.iota {dimensions = array<i32: 1>} : vector<8x8xi32>
    %c0_i32 = arith.constant 0 : i32
    %4 = vector.broadcast %c0_i32 : i32 to vector<8x8xi32>
    %5 = arith.cmpi eq, %3, %4 : vector<8x8xi32>
    %c1_i32 = arith.constant 1 : i32
    %6 = vector.broadcast %c1_i32 : i32 to vector<8x8xi32>
    %7 = arith.cmpi sge, %3, %6 : vector<8x8xi32>
    %8 = arith.subf %0, %1 : vector<8x8xf32>
    %9 = math.absf %8 : vector<8x8xf32>
    %cst = arith.constant 1.000000e+00 : f32
    %10 = vector.broadcast %cst : f32 to vector<8x8xf32>
    %11 = arith.cmpf olt, %9, %10 : vector<8x8xf32>
    %cst_3 = arith.constant 5.000000e-01 : f32
    %12 = vector.broadcast %cst_3 : f32 to vector<8x8xf32>
    %13 = arith.mulf %12, %8 : vector<8x8xf32>
    %14 = arith.mulf %13, %8 : vector<8x8xf32>
    %cst_4 = arith.constant 5.000000e-01 : f32
    %15 = vector.broadcast %cst_4 : f32 to vector<8x8xf32>
    %16 = arith.subf %9, %15 : vector<8x8xf32>
    %17 = arith.select %11, %14, %16 : vector<8x8xi1>, vector<8x8xf32>
    %cst_5 = arith.constant 0.000000e+00 : f32
    %18 = vector.broadcast %cst_5 : f32 to vector<8x8xf32>
    %19 = arith.select %5, %17, %18 : vector<8x8xi1>, vector<8x8xf32>
    %20 = vector.shape_cast %19 : vector<8x8xf32> to vector<1x8x8xf32>
    %cst_6 = arith.constant dense<0.000000e+00> : vector<1xf32>
    %21 = vector.multi_reduction <add>, %20, %cst_6 [1, 2] : vector<1x8x8xf32> to vector<1xf32>
    %22 = vector.shape_cast %21 : vector<1xf32> to vector<1x1x1xf32>
    %23 = vector.extract %22[0, 0, 0] : f32 from vector<1x1x1xf32>
    %24 = arith.mulf %8, %8 : vector<8x8xf32>
    %cst_7 = arith.constant 0.000000e+00 : f32
    %25 = vector.broadcast %cst_7 : f32 to vector<8x8xf32>
    %26 = arith.select %7, %24, %25 : vector<8x8xi1>, vector<8x8xf32>
    %27 = vector.shape_cast %26 : vector<8x8xf32> to vector<1x8x8xf32>
    %cst_8 = arith.constant dense<0.000000e+00> : vector<1xf32>
    %28 = vector.multi_reduction <add>, %27, %cst_8 [1, 2] : vector<1x8x8xf32> to vector<1xf32>
    %29 = vector.shape_cast %28 : vector<1xf32> to vector<1x1x1xf32>
    %30 = vector.extract %29[0, 0, 0] : f32 from vector<1x1x1xf32>
    %cst_9 = arith.constant 0.000000e+00 : f32
    %31 = vector.broadcast %cst_9 : f32 to vector<8x8xf32>
    %32 = arith.subf %31, %0 : vector<8x8xf32>
    %cst_10 = arith.constant 0.000000e+00 : f32
    %33 = vector.broadcast %cst_10 : f32 to vector<8x8xf32>
    %34 = arith.maximumf %32, %33 : vector<8x8xf32>
    %cst_11 = arith.constant 1.000000e+00 : f32
    %35 = vector.broadcast %cst_11 : f32 to vector<8x8xf32>
    %36 = arith.subf %0, %35 : vector<8x8xf32>
    %cst_12 = arith.constant 0.000000e+00 : f32
    %37 = vector.broadcast %cst_12 : f32 to vector<8x8xf32>
    %38 = arith.maximumf %36, %37 : vector<8x8xf32>
    %39 = arith.addf %34, %38 : vector<8x8xf32>
    %cst_13 = arith.constant 0.000000e+00 : f32
    %40 = vector.broadcast %cst_13 : f32 to vector<8x8xf32>
    %41 = arith.select %5, %39, %40 : vector<8x8xi1>, vector<8x8xf32>
    %42 = vector.shape_cast %41 : vector<8x8xf32> to vector<1x8x8xf32>
    %cst_14 = arith.constant dense<0.000000e+00> : vector<1xf32>
    %43 = vector.multi_reduction <add>, %42, %cst_14 [1, 2] : vector<1x8x8xf32> to vector<1xf32>
    %44 = vector.shape_cast %43 : vector<1xf32> to vector<1x1x1xf32>
    %45 = vector.extract %44[0, 0, 0] : f32 from vector<1x1x1xf32>
    %cst_15 = arith.constant 0.000000e+00 : f32
    %46 = vector.broadcast %cst_15 : f32 to vector<8x8xf32>
    %47 = arith.select %7, %34, %46 : vector<8x8xi1>, vector<8x8xf32>
    %48 = vector.shape_cast %47 : vector<8x8xf32> to vector<1x8x8xf32>
    %cst_16 = arith.constant dense<0.000000e+00> : vector<1xf32>
    %49 = vector.multi_reduction <add>, %48, %cst_16 [1, 2] : vector<1x8x8xf32> to vector<1xf32>
    %50 = vector.shape_cast %49 : vector<1xf32> to vector<1x1x1xf32>
    %51 = vector.extract %50[0, 0, 0] : f32 from vector<1x1x1xf32>
    %c7_i32 = arith.constant 7 : i32
    %52 = tpu.dynamic_rotate %0 by %c7_i32 dim 0 : vector<8x8xf32>, i32 -> vector<8x8xf32>
    %c7_i32_17 = arith.constant 7 : i32
    %53 = vector.broadcast %c7_i32_17 : i32 to vector<8x8xi32>
    %54 = arith.cmpi slt, %2, %53 : vector<8x8xi32>
    %55 = arith.andi %5, %54 : vector<8x8xi1>
    %56 = arith.subf %52, %0 : vector<8x8xf32>
    %cst_18 = arith.constant 0.000000e+00 : f32
    %57 = vector.broadcast %cst_18 : f32 to vector<8x8xf32>
    %58 = arith.maximumf %56, %57 : vector<8x8xf32>
    %cst_19 = arith.constant 0.000000e+00 : f32
    %59 = vector.broadcast %cst_19 : f32 to vector<8x8xf32>
    %60 = arith.select %55, %58, %59 : vector<8x8xi1>, vector<8x8xf32>
    %61 = vector.shape_cast %60 : vector<8x8xf32> to vector<1x8x8xf32>
    %cst_20 = arith.constant dense<0.000000e+00> : vector<1xf32>
    %62 = vector.multi_reduction <add>, %61, %cst_20 [1, 2] : vector<1x8x8xf32> to vector<1xf32>
    %63 = vector.shape_cast %62 : vector<1xf32> to vector<1x1x1xf32>
    %64 = vector.extract %63[0, 0, 0] : f32 from vector<1x1x1xf32>
    %cst_21 = arith.constant 8.000000e+00 : f32
    %65 = arith.divf %23, %cst_21 : f32
    %cst_22 = arith.constant 5.600000e+01 : f32
    %66 = arith.divf %30, %cst_22 : f32
    %cst_23 = arith.constant 8.000000e+00 : f32
    %67 = arith.divf %45, %cst_23 : f32
    %cst_24 = arith.constant 5.600000e+01 : f32
    %68 = arith.divf %51, %cst_24 : f32
    %69 = arith.addf %67, %68 : f32
    %cst_25 = arith.constant 7.000000e+00 : f32
    %70 = arith.divf %64, %cst_25 : f32
    %71 = arith.addf %65, %66 : f32
    %cst_26 = arith.constant 1.000000e-01 : f32
    %72 = arith.mulf %cst_26, %69 : f32
    %73 = arith.addf %71, %72 : f32
    %cst_27 = arith.constant 5.000000e-02 : f32
    %74 = arith.mulf %cst_27, %70 : f32
    %75 = arith.addf %73, %74 : f32
    %c0_28 = arith.constant 0 : index
    %76 = memref.load %arg3[%c0_28] : memref<5xf32, #tpu.memory_space<smem>>
    memref.store %75, %arg3[%c0_28] : memref<5xf32, #tpu.memory_space<smem>>
    %c1 = arith.constant 1 : index
    %77 = memref.load %arg3[%c1] : memref<5xf32, #tpu.memory_space<smem>>
    memref.store %65, %arg3[%c1] : memref<5xf32, #tpu.memory_space<smem>>
    %c2 = arith.constant 2 : index
    %78 = memref.load %arg3[%c2] : memref<5xf32, #tpu.memory_space<smem>>
    memref.store %66, %arg3[%c2] : memref<5xf32, #tpu.memory_space<smem>>
    %c3 = arith.constant 3 : index
    %79 = memref.load %arg3[%c3] : memref<5xf32, #tpu.memory_space<smem>>
    memref.store %69, %arg3[%c3] : memref<5xf32, #tpu.memory_space<smem>>
    %c4 = arith.constant 4 : index
    %80 = memref.load %arg3[%c4] : memref<5xf32, #tpu.memory_space<smem>>
    memref.store %70, %arg3[%c4] : memref<5xf32, #tpu.memory_space<smem>>
    return
  }
  func.func @transform_0(%arg0: i32) -> (i32, i32) {
    %c0_i32 = arith.constant 0 : i32
    %c0_i32_0 = arith.constant 0 : i32
    return %arg0, %c0_i32 : i32, i32
  }
  func.func @transform_1(%arg0: i32) -> (i32, i32) {
    %c0_i32 = arith.constant 0 : i32
    %c0_i32_0 = arith.constant 0 : i32
    return %arg0, %c0_i32 : i32, i32
  }
  func.func @transform_2(%arg0: i32) -> i32 {
    %c0_i32 = arith.constant 0 : i32
    %c0_i32_0 = arith.constant 0 : i32
    return %c0_i32 : i32
  }
}

</mosaic_0001>

<bundles_post_ra>
// kernel: tpu_custom_call.1
= control target key start
LH: loop header
LB: loop body
LE: loop exit
PB: predicated region body
PF: predicated region fallthrough
CT: control target
= control target key end

     0   :  { %7 = vsyncpa [#allocation5], 0  ;;  %s303_s0 = inlined_call_operand.hbm [shape: f32[8,8], index: 0, kind: input, shape index: {}]   ;;  %s304_s1 = inlined_call_operand.hbm [shape: f32[8,8], index: 1, kind: input, shape index: {}]   ;;  %s305_s2 = inlined_call_operand.hbm [shape: f32[5], index: 2, kind: output, shape index: {}]  }
   0x1   :  { %8 = vsyncpa [#allocation8], 0 }
   0x2   :  { %9 = vsyncpa [#allocation6], 0  ;;  %s239_s9 = smov [#allocation4]   ;;  %s240_s11 = smov [#allocation7]  }
   0x3   :  { %s16_s10 = sshll.u32 %s239_s9, 4  ;;  %s26_s12 = sshll.u32 %s240_s11, 4  ;;  %s17_s10 = int_to_ptr.vmem [resolvable:$true] %s16_s10  ;;  %s27_s12 = int_to_ptr.vmem [resolvable:$true] %s26_s12 }
   0x4   :  { %s179_s15 = scalar_lea.hbm %s303_s0, 128 }
   0x5   :  { %p180_p0 = scmp.ne.s32.totalorder %s303_s0, %s179_s15  ;;  %p183_p1 = scmp.lt.u32.totalorder %s179_s15, %s303_s0 }
   0x7   :  { %p185_p2 = pnand %p183_p1, %p180_p0 }
   0x9   :  { %188 = shalt.err (!%p185_p2)
}
   0xa   :  { %s189_s20 = scalar_lea.vmem %s17_s10, 128  ;;  %p194_p4 = scmp.lt.s32.totalorder %s17_s10, %s17_s10 }
   0xb   :  { %p190_p3 = scmp.ne.s32.totalorder %s17_s10, %s189_s20  ;;  %p195_p5 = scmp.lt.s32.totalorder %s189_s20, %s189_s20 }
   0xd   :  { %p196_p6 = por %p195_p5, %p194_p4 }
   0xf   :  { %p197_p7 = pnand %p196_p6, %p190_p3 }
  0x11   :  { %200 = shalt.err (!%p197_p7)
}
  0x12   :  { %19 = dma.hbm_to_vmem [thread:$0]  %s303_s0, 128, %s17_s10, [#allocation5]  }
  0x13   :  { %s201_s25 = scalar_lea.hbm %s304_s1, 128 }
  0x14   :  { %p202_p8 = scmp.ne.s32.totalorder %s304_s1, %s201_s25  ;;  %p205_p9 = scmp.lt.u32.totalorder %s201_s25, %s304_s1 }
  0x16   :  { %p207_p10 = pnand %p205_p9, %p202_p8 }
  0x18   :  { %210 = shalt.err (!%p207_p10)
}
  0x19   :  { %s211_s30 = scalar_lea.vmem %s27_s12, 128  ;;  %p216_p12 = scmp.lt.s32.totalorder %s27_s12, %s27_s12 }
  0x1a   :  { %p212_p11 = scmp.ne.s32.totalorder %s27_s12, %s211_s30  ;;  %p217_p13 = scmp.lt.s32.totalorder %s211_s30, %s211_s30 }
  0x1c   :  { %p218_p0 = por %p217_p13, %p216_p12 }
  0x1e   :  { %p219_p1 = pnand %p218_p0, %p212_p11 }
  0x20   :  { %222 = shalt.err (!%p219_p1)
}
  0x21   :  { %29 = dma.hbm_to_vmem [thread:$0]  %s304_s1, 128, %s27_s12, [#allocation8]  }
  0x22   :  { %233 = dma.done.wait [#allocation5], 128  }
  0x23   :  { %234 = vsyncadd [#allocation5], 4294967168 }
  0x24   :  { %235 = dma.done.wait [#allocation8], 128  }
  0x25   :  { %236 = vsyncadd [#allocation8], 4294967168  ;;  %v38_v0 = vlaneseq  ;;  %v36_v3 = vld [vmem:[#allocation4] sm:$0xff]  ;;  %v37_v4 = vld [vmem:[#allocation7] sm:$0xff]  ;;  %vm52_vm1 = vcmask 64512   ;;  %s223_s21 = scalar_lea.hbm %s305_s2, 16 }
  0x26   :  { %v44_v5 = vsub.f32 %v36_v3, %v37_v4  ;;  %v75_v6 = vsub.f32 0.0, %v36_v3  ;;  %v165_v7 = vadd.f32 -1.0, %v36_v3  ;;  %v102_v8 = vrot.slane %v36_v3, 1  ;;  %p224_p2 = scmp.ne.s32.totalorder %s305_s2, %s223_s21  ;;  %p227_p3 = scmp.lt.u32.totalorder %s223_s21, %s305_s2 }
  0x27   :  { %v41_v1 = vand.u32 127, %v38_v0  ;;  %v39_v2 = vshrl.u32 %v38_v0, 7 }
  0x28   :  { %v63_v9 = vmul.f32 %v44_v5, %v44_v5  ;;  %v76_v10 = vmax.f32 %v75_v6, 0.0  ;;  %v78_v11 = vmax.f32 %v165_v7, 0.0  ;;  %v45_v12 = vand.u32 2147483647, %v44_v5  ;;  %p229_p4 = pnand %p227_p3, %p224_p2 }
  0x29   :  { %vm43_vm0 = vcmp.ge.s32.totalorder %v41_v1, 1  ;;  %vm103_vm2 = vcmp.lt.s32.totalorder %v39_v2, 7  ;;  %vm42_vm3 = vcmp.eq.s32.totalorder %v41_v1, 0  ;;  %v47_v13 = vmul.f32 0.5, %v44_v5 }
  0x2a   :  { %v105_v14 = vsub.f32 %v102_v8, %v36_v3  ;;  %v64_v15 = vsel %vm43_vm0, %v63_v9, 0.0  ;;  %v79_v16 = vadd.f32 %v78_v11, %v76_v10  ;;  %vm46_vm4 = vcmp.lt.f32.partialorder %v45_v12, 1.0  ;;  %vm104_vm5 = vmand %vm42_vm3, %vm103_vm2 }
  0x2b   :  { %v164_v17 = vadd.f32 -0.5, %v45_v12  ;;  %v65_v18 = vsel %vm52_vm1, %v64_v15, 0.0  ;;  %v48_v19 = vmul.f32 %v47_v13, %v44_v5  ;;  %v91_v22 = vsel %vm43_vm0, %v76_v10, 0.0 }
  0x2c   :  { %v106_v20 = vmax.f32 %v105_v14, 0.0  ;;  %66 = vadd.xlane.f32.xlu0 %v65_v18  ;;  %v80_v21 = vsel %vm42_vm3, %v79_v16, 0.0  ;;  %v92_v28 = vsel %vm52_vm1, %v91_v22, 0.0 }
  0x2d   :  { %v81_v23 = vsel %vm52_vm1, %v80_v21, 0.0  ;;  %v50_v24 = vsel %vm46_vm4, %v48_v19, %v164_v17 }
  0x2e   :  { %82 = vadd.xlane.f32.xlu1 %v81_v23  ;;  %v51_v25 = vsel %vm42_vm3, %v50_v24, 0.0  ;;  %v107_v26 = vsel %vm104_vm5, %v106_v20, 0.0 }
  0x2f   :  { %v53_v27 = vsel %vm52_vm1, %v51_v25, 0.0  ;;  %v108_v29 = vsel %vm52_vm1, %v107_v26, 0.0 }
  0x30   :  { %54 = vadd.xlane.f32.xlu0 %v53_v27 }
  0x32   :  { %93 = vadd.xlane.f32.xlu1 %v92_v28 }
  0x34   :  { %109 = vadd.xlane.f32.xlu0 %v108_v29 }
  0xb9   :  { %v67_v30 = vpop.xlane.xlu0 %66 }
  0xba   :  { %v68_v31 = vrot.slane %v67_v30, 4 }
  0xbb   :  { %v83_v32 = vpop.xlane.xlu1 %82 }
  0xbc   :  { %v69_v33 = vadd.f32 %v68_v31, %v67_v30  ;;  %v84_v34 = vrot.slane %v83_v32, 4 }
  0xbd   :  { %v55_v35 = vpop.xlane.xlu0 %54 }
  0xbe   :  { %v70_v36 = vrot.slane %v69_v33, 2  ;;  %v85_v37 = vadd.f32 %v84_v34, %v83_v32  ;;  %v56_v38 = vrot.slane %v55_v35, 4 }
  0xbf   :  { %v94_v39 = vpop.xlane.xlu1 %93 }
  0xc0   :  { %v86_v40 = vrot.slane %v85_v37, 2  ;;  %v57_v41 = vadd.f32 %v56_v38, %v55_v35  ;;  %v95_v42 = vrot.slane %v94_v39, 4  ;;  %v71_v44 = vadd.f32 %v70_v36, %v69_v33 }
  0xc1   :  { %v110_v43 = vpop.xlane.xlu0 %109 }
  0xc2   :  { %v58_v45 = vrot.slane %v57_v41, 2  ;;  %v96_v46 = vadd.f32 %v95_v42, %v94_v39  ;;  %v111_v47 = vrot.slane %v110_v43, 4  ;;  %v87_v48 = vadd.f32 %v86_v40, %v85_v37 }
  0xc3   :  { %v72_v52 = vrot.slane %v71_v44, 1 }
  0xc4   :  { %v97_v49 = vrot.slane %v96_v46, 2  ;;  %v112_v50 = vadd.f32 %v111_v47, %v110_v43  ;;  %v59_v51 = vadd.f32 %v58_v45, %v57_v41  ;;  %v88_v56 = vrot.slane %v87_v48, 1 }
  0xc5   :  { %v73_v60 = vadd.f32 %v72_v52, %v71_v44 }
  0xc6   :  { %v98_v53 = vadd.f32 %v97_v49, %v96_v46  ;;  %v113_v54 = vrot.slane %v112_v50, 2  ;;  %v60_v55 = vrot.slane %v59_v51, 1  ;;  %v89_v61 = vadd.f32 %v88_v56, %v87_v48 }
  0xc8   :  { %v114_v57 = vadd.f32 %v113_v54, %v112_v50  ;;  %v61_v58 = vadd.f32 %v60_v55, %v59_v51  ;;  %v99_v59 = vrot.slane %v98_v53, 1 }
  0xca   :  { %166 = vpush %v61_v58  ;;  %v100_v62 = vadd.f32 %v99_v59, %v98_v53  ;;  %v115_v63 = vrot.slane %v114_v57, 1 }
  0xcb   :  { %168 = vpush %v73_v60 }
  0xcc   :  { %170 = vpush %v89_v61  ;;  %v116_v0 = vadd.f32 %v115_v63, %v114_v57 }
  0xcd   :  { %172 = vpush %v100_v62 }
  0xce   :  { %174 = vpush %v116_v0 }
  0xfb   :  { %s167_s1 = spop %166 }
  0xfc   :  { %s120_s4 = smul.f32 0.125, %s167_s1  ;;  %s169_s5 = spop %168 }
  0xfd   :  { %s123_s6 = smul.f32 0.017857144, %s169_s5  ;;  %s171_s7 = spop %170 }
  0xfe   :  { %142 = sst [smem:[#allocation9 + $0x1]] %s120_s4  ;;  %s126_s8 = smul.f32 0.125, %s171_s7 }
  0xff   :  { %s173_s9 = spop %172  ;;  %144 = sst [smem:[#allocation9 + $0x2]] %s123_s6 }
 0x100   :  { %s129_s10 = smul.f32 0.017857144, %s173_s9  ;;  %s175_s11 = spop %174 }
 0x101   :  { %s133_s13 = smul.f32 0.14285715, %s175_s11  ;;  %s134_s14 = sadd.f32 %s123_s6, %s120_s4 }
 0x102   :  { %s130_s12 = sadd.f32 %s129_s10, %s126_s8 }
 0x103   :  { %148 = sst [smem:[#allocation9 + $0x4]] %s133_s13  ;;  %s137_s17 = smul.f32 0.05, %s133_s13 }
 0x104   :  { %s135_s15 = smul.f32 0.1, %s130_s12  ;;  %146 = sst [smem:[#allocation9 + $0x3]] %s130_s12 }
 0x106   :  { %s136_s16 = sadd.f32 %s135_s15, %s134_s14 }
 0x108   :  { %s138_s18 = sadd.f32 %s137_s17, %s136_s16 }
 0x10a   :  { %140 = sst [smem:[#allocation9]] %s138_s18 }
 0x10b   :  { %232 = shalt.err (!%p229_p4)
}
 0x10c   :  { %s241_s26 = smov [#allocation9]  }
 0x10d   :  { %156 = dma.smem_to_hbm %s241_s26, 16, %s305_s2, [#allocation6]  }
 0x10e   :  { %237 = dma.done.wait [#allocation6], 16  }
 0x10f   :  { %238 = vsyncadd [#allocation6], 4294967280 }
 0x110   :  { %160 = sfence }
 0x111   :  { %161 = vsyncpa [#allocation5], 1 }
 0x112   :  { %162 = vsyncpa [#allocation8], 1 }
 0x113   :  { %163 = vsyncpa [#allocation6], 1 }

</bundles_post_ra>
